<compile_context>
chip_gen: v7x
topology: tpu7x:2x2x1
jax: 0.10.0
libtpu: 0.0.40
codegen_flags: <defaults>
</compile_context>

<pallas_src>
import jax
import jax.numpy as jnp
from jax.experimental import pallas as pl
from jax.experimental.pallas import tpu as pltpu

N_NEURONS = 20
LANE = 128
MAX_TILE = 8192          # max batch lanes per grid step (large-N path)
SINGLE_STEP_MAX = 512    # above this, force >=2 (even) grid steps for v7x megacore


def pinn_kernel(x_ref, p_ref, o_ref):
    """Full 4-layer MLP on one (1, TILE) batch slab; all compute stays in VMEM."""
    x = x_ref[...]                      # (1, TILE)

    # Static slices of the packed, pre-folded parameter block.
    w2 = p_ref[0:20, 0:20]              # (20, 20)  = 0.25 * W2
    w3 = p_ref[20:40, 0:20]             # (20, 20)  = 0.25 * W3
    w1 = p_ref[40:60, 0:1]              # (20, 1)   = 0.5  * W1[:, 0]
    b1 = p_ref[40:60, 1:2]              # (20, 1)   = 0.5  * b1
    b2 = p_ref[40:60, 2:3]              # (20, 1)   = 0.25*rowsum(W2) + 0.5*b2
    b3 = p_ref[40:60, 3:4]              # (20, 1)   = 0.25*rowsum(W3) + 0.5*b3
    w4 = p_ref[40:60, 4:5]              # (20, 1)   = 0.5  * W4[0, :]
    b4 = p_ref[60:61, 0:1]              # (1, 1)    = 0.5*sum(W4) + b4

    # Layer 1: Linear(1,20)+sigmoid folded into a broadcast FMA + tanh (VPU+EUP).
    t = jnp.tanh(w1 * x + b1)                                            # (20, TILE)
    # Layers 2, 3: 20x20 MXU dots; sigmoid folded into the weights -> plain tanh.
    t = jnp.tanh(jnp.dot(w2, t, preferred_element_type=jnp.float32) + b2)
    t = jnp.tanh(jnp.dot(w3, t, preferred_element_type=jnp.float32) + b3)
    # Layer 4: Linear(20,1) as VPU multiply + sublane reduce (hidden under EUP slack).
    y = jnp.sum(w4 * t, axis=0, keepdims=True) + b4                      # (1, TILE)
    o_ref[...] = y.astype(o_ref.dtype)


def init_params(key, n_hidden=3, n_neurons=N_NEURONS):
    """PyTorch-Linear-style init: W (out, in), b (out,), U(-1/sqrt(fan_in), +)."""
    dims = [1] + [n_neurons] * n_hidden + [1]   # [1, 20, 20, 20, 1]
    params = []
    for i in range(len(dims) - 1):
        fan_in, fan_out = dims[i], dims[i + 1]
        bound = 1.0 / (fan_in ** 0.5)
        key, kw, kb = jax.random.split(key, 3)
        w = jax.random.uniform(kw, (fan_out, fan_in), jnp.float32, -bound, bound)
        b = jax.random.uniform(kb, (fan_out,), jnp.float32, -bound, bound)
        params.append((w, b))
    return params


def pack_params(params):
    """Pack all weights/biases into one (64, 128) f32 block, folding the sigmoid
    affine constants (0.5*tanh(0.5*z)+0.5) into the weights/biases. Done once."""
    (w1, b1), (w2, b2), (w3, b3), (w4, b4) = params
    p = jnp.zeros((64, 128), jnp.float32)
    p = p.at[0:20, 0:20].set(0.25 * w2)
    p = p.at[20:40, 0:20].set(0.25 * w3)
    p = p.at[40:60, 0].set(0.5 * w1[:, 0])
    p = p.at[40:60, 1].set(0.5 * b1)
    p = p.at[40:60, 2].set(0.25 * jnp.sum(w2, axis=1) + 0.5 * b2)
    p = p.at[40:60, 3].set(0.25 * jnp.sum(w3, axis=1) + 0.5 * b3)
    p = p.at[40:60, 4].set(0.5 * w4[0, :])
    p = p.at[60, 0].set(0.5 * jnp.sum(w4) + b4[0])
    return p


def _choose_tiling(n):
    """Return (tile, steps): lane-dense tile size (multiple of 128) and grid steps."""
    n128 = ((n + LANE - 1) // LANE) * LANE
    if n128 <= SINGLE_STEP_MAX:
        return n128, 1                       # one step: minimal pipeline overhead
    steps = max(2, (n128 + MAX_TILE - 1) // MAX_TILE)
    if steps % 2:                            # even step count -> both v7x TCs busy
        steps += 1
    tile = ((n128 + steps - 1) // steps + LANE - 1) // LANE * LANE
    return tile, steps


def pinn_1d_forward(x, packed_params):
    """x: (N, 1) float32 -> (N, 1) float32."""
    n = x.shape[0]
    x_t = x.reshape(1, n)                    # batch onto the lane axis (free reshape)

    tile, steps = _choose_tiling(n)
    n_pad = tile * steps
    if n_pad != n:
        # Ragged-tail pad on the lane axis; padded lanes compute finite garbage
        # that is sliced off below (no cross-lane reductions in this kernel).
        x_t = jnp.pad(x_t, ((0, 0), (0, n_pad - n)))

    out = pl.pallas_call(
        pinn_kernel,
        out_shape=jax.ShapeDtypeStruct((1, n_pad), jnp.float32),
        grid_spec=pltpu.PrefetchScalarGridSpec(
            num_scalar_prefetch=0,
            grid=(steps,),
            in_specs=[
                pl.BlockSpec((1, tile), lambda i: (0, i)),               # x (lane-dense)
                pl.BlockSpec(packed_params.shape, lambda i: (0, 0)),     # packed params
            ],
            out_specs=pl.BlockSpec((1, tile), lambda i: (0, i)),         # y (lane-dense)
        ),
        compiler_params=pltpu.CompilerParams(
            dimension_semantics=("parallel",)),
    )(x_t, packed_params)

    return out[0, :n].reshape(n, 1)


def pinn_1d_reference(x, params):
    h = x
    for i, (w, b) in enumerate(params):
        h = h @ w.T + b
        if i < len(params) - 1:
            h = jax.nn.sigmoid(h)
    return h


if __name__ == "__main__":
    key = jax.random.PRNGKey(0)
    k_params, k_x1, k_x2 = jax.random.split(key, 3)

    params = init_params(k_params)
    packed = pack_params(params)

    # Small 1-D PINN collocation batch: 256 points in [0, 1], shape (N, 1).
    # Single-grid-step path.
    N1 = 256
    x1 = jax.random.uniform(k_x1, (N1, 1), jnp.float32)
    y1 = jax.block_until_ready(pinn_1d_forward(x1, packed))
    y1_ref = pinn_1d_reference(x1, params)
    assert y1.shape == (N1, 1)
    assert jnp.allclose(y1, y1_ref, atol=1e-5, rtol=1e-4), "mismatch vs reference (N=256)"

    # Larger ragged batch: exercises padding + the multi-step (even-grid) path.
    N2 = 1000
    x2 = jax.random.uniform(k_x2, (N2, 1), jnp.float32)
    y2 = jax.block_until_ready(pinn_1d_forward(x2, packed))
    y2_ref = pinn_1d_reference(x2, params)
    assert y2.shape == (N2, 1)
    assert jnp.allclose(y2, y2_ref, atol=1e-5, rtol=1e-4), "mismatch vs reference (N=1000)"

    print("KERNEL_OK")
</pallas_src>

<mosaic_0001>
module attributes {stable_mosaic.version = 11 : i64} {
  func.func @pinn_kernel(%arg0: i32, %arg1: memref<1x256xf32, #tpu.memory_space<vmem>>, %arg2: memref<64x128xf32, #tpu.memory_space<vmem>>, %arg3: memref<1x256xf32, #tpu.memory_space<vmem>>) attributes {dimension_semantics = [#tpu.dimension_semantics<parallel>], iteration_bounds = array<i64: 1>, scalar_prefetch = 0 : i64, scratch_operands = 0 : i64, tpu.core_type = #tpu.core_type<tc>, window_params = [{transform_indices = @transform_0, window_bounds = array<i64: 1, 256>}, {pipeline_mode = #tpu.pipeline_mode<synchronous>, transform_indices = @transform_1, window_bounds = array<i64: 64, 128>}, {transform_indices = @transform_2, window_bounds = array<i64: 1, 256>}]} {
    %c0 = arith.constant 0 : index
    %c0_0 = arith.constant 0 : index
    %0 = vector.load %arg1[%c0, %c0_0] : memref<1x256xf32, #tpu.memory_space<vmem>>, vector<1x256xf32>
    %c0_1 = arith.constant 0 : index
    %c0_2 = arith.constant 0 : index
    %1 = vector.load %arg2[%c0_1, %c0_2] : memref<64x128xf32, #tpu.memory_space<vmem>>, vector<20x20xf32>
    %c20 = arith.constant 20 : index
    %c0_3 = arith.constant 0 : index
    %2 = vector.load %arg2[%c20, %c0_3] : memref<64x128xf32, #tpu.memory_space<vmem>>, vector<20x20xf32>
    %c40 = arith.constant 40 : index
    %c0_4 = arith.constant 0 : index
    %3 = vector.load %arg2[%c40, %c0_4] : memref<64x128xf32, #tpu.memory_space<vmem>>, vector<20x1xf32>
    %c40_5 = arith.constant 40 : index
    %c1 = arith.constant 1 : index
    %4 = vector.load %arg2[%c40_5, %c1] : memref<64x128xf32, #tpu.memory_space<vmem>>, vector<20x1xf32>
    %c40_6 = arith.constant 40 : index
    %c2 = arith.constant 2 : index
    %5 = vector.load %arg2[%c40_6, %c2] : memref<64x128xf32, #tpu.memory_space<vmem>>, vector<20x1xf32>
    %c40_7 = arith.constant 40 : index
    %c3 = arith.constant 3 : index
    %6 = vector.load %arg2[%c40_7, %c3] : memref<64x128xf32, #tpu.memory_space<vmem>>, vector<20x1xf32>
    %c40_8 = arith.constant 40 : index
    %c4 = arith.constant 4 : index
    %7 = vector.load %arg2[%c40_8, %c4] : memref<64x128xf32, #tpu.memory_space<vmem>>, vector<20x1xf32>
    %c60 = arith.constant 60 : index
    %c0_9 = arith.constant 0 : index
    %8 = vector.load %arg2[%c60, %c0_9] : memref<64x128xf32, #tpu.memory_space<vmem>>, vector<1x1xf32>
    %9 = vector.broadcast %3 : vector<20x1xf32> to vector<20x256xf32>
    %10 = vector.broadcast %0 : vector<1x256xf32> to vector<20x256xf32>
    %11 = arith.mulf %9, %10 : vector<20x256xf32>
    %12 = vector.broadcast %4 : vector<20x1xf32> to vector<20x256xf32>
    %13 = arith.addf %11, %12 : vector<20x256xf32>
    %14 = math.tanh %13 : vector<20x256xf32>
    %cst = arith.constant dense<0.000000e+00> : vector<20x256xf32>
    %15 = tpu.matmul %1, %14, %cst {dimension_numbers = #tpu.dot_dimension_numbers<[1], [0], [0], [1], [0, 0, 1, 1], [], []>} : vector<20x20xf32>, vector<20x256xf32>, vector<20x256xf32> -> vector<20x256xf32>
    %16 = vector.broadcast %5 : vector<20x1xf32> to vector<20x256xf32>
    %17 = arith.addf %15, %16 : vector<20x256xf32>
    %18 = math.tanh %17 : vector<20x256xf32>
    %cst_10 = arith.constant dense<0.000000e+00> : vector<20x256xf32>
    %19 = tpu.matmul %2, %18, %cst_10 {dimension_numbers = #tpu.dot_dimension_numbers<[1], [0], [0], [1], [0, 0, 1, 1], [], []>} : vector<20x20xf32>, vector<20x256xf32>, vector<20x256xf32> -> vector<20x256xf32>
    %20 = vector.broadcast %6 : vector<20x1xf32> to vector<20x256xf32>
    %21 = arith.addf %19, %20 : vector<20x256xf32>
    %22 = math.tanh %21 : vector<20x256xf32>
    %23 = vector.broadcast %7 : vector<20x1xf32> to vector<20x256xf32>
    %24 = arith.mulf %23, %22 : vector<20x256xf32>
    %cst_11 = arith.constant dense<0.000000e+00> : vector<256xf32>
    %25 = vector.multi_reduction <add>, %24, %cst_11 [0] : vector<20x256xf32> to vector<256xf32>
    %26 = vector.shape_cast %25 : vector<256xf32> to vector<1x256xf32>
    %27 = vector.broadcast %8 : vector<1x1xf32> to vector<1x256xf32>
    %28 = arith.addf %26, %27 : vector<1x256xf32>
    %c0_12 = arith.constant 0 : index
    %c0_13 = arith.constant 0 : index
    %29 = vector.load %arg3[%c0_12, %c0_13] : memref<1x256xf32, #tpu.memory_space<vmem>>, vector<1x256xf32>
    tpu.vector_store %arg3[%c0_12, %c0_13], %28 {strides = array<i32>} : memref<1x256xf32, #tpu.memory_space<vmem>>, vector<1x256xf32>,
    return
  }
  func.func @transform_0(%arg0: i32) -> (i32, i32) {
    %c0_i32 = arith.constant 0 : i32
    %c0_i32_0 = arith.constant 0 : i32
    return %c0_i32, %arg0 : i32, i32
  }
  func.func @transform_1(%arg0: i32) -> (i32, i32) {
    %c0_i32 = arith.constant 0 : i32
    %c0_i32_0 = arith.constant 0 : i32
    %c0_i32_1 = arith.constant 0 : i32
    return %c0_i32, %c0_i32_0 : i32, i32
  }
  func.func @transform_2(%arg0: i32) -> (i32, i32) {
    %c0_i32 = arith.constant 0 : i32
    %c0_i32_0 = arith.constant 0 : i32
    return %c0_i32, %arg0 : i32, i32
  }
}

</mosaic_0001>

<bundles_post_ra>
// kernel: tpu_custom_call.1
= control target key start
LH: loop header
LB: loop body
LE: loop exit
PB: predicated region body
PF: predicated region fallthrough
CT: control target
= control target key end

     0   :  { %7 = vsyncpa [#allocation3], 0  ;;  %s686_s0 = inlined_call_operand.hbm [shape: f32[1,256], index: 0, kind: input, shape index: {}]   ;;  %s687_s1 = inlined_call_operand.hbm [shape: f32[64,128], index: 1, kind: input, shape index: {}]   ;;  %s688_s2 = inlined_call_operand.hbm [shape: f32[1,256], index: 2, kind: output, shape index: {}]  }
   0x1   :  { %8 = vsyncpa [#allocation6], 0 }
   0x2   :  { %9 = vsyncpa [#allocation4], 0  ;;  %s568_s9 = smov [#allocation2]   ;;  %s569_s11 = smov [#allocation5]  }
   0x3   :  { %s16_s10 = sshll.u32 %s568_s9, 4  ;;  %s25_s12 = sshll.u32 %s569_s11, 4  ;;  %s17_s10 = int_to_ptr.vmem [resolvable:$true] %s16_s10  ;;  %s595_s12 = int_to_ptr.vmem [resolvable:$true] %s25_s12 }
   0x4   :  { %s496_s15 = scalar_lea.hbm %s686_s0, 32 }
   0x5   :  { %p497_p0 = scmp.ne.s32.totalorder %s686_s0, %s496_s15  ;;  %p500_p1 = scmp.lt.u32.totalorder %s496_s15, %s686_s0 }
   0x7   :  { %p502_p2 = pnand %p500_p1, %p497_p0 }
   0x9   :  { %505 = shalt.err (!%p502_p2)
}
   0xa   :  { %s506_s20 = scalar_lea.vmem %s17_s10, 32  ;;  %p511_p4 = scmp.lt.s32.totalorder %s17_s10, %s17_s10 }
   0xb   :  { %p507_p3 = scmp.ne.s32.totalorder %s17_s10, %s506_s20  ;;  %p512_p5 = scmp.lt.s32.totalorder %s506_s20, %s506_s20 }
   0xd   :  { %p513_p6 = por %p512_p5, %p511_p4 }
   0xf   :  { %p514_p7 = pnand %p513_p6, %p507_p3 }
  0x11   :  { %517 = shalt.err (!%p514_p7)
}
  0x12   :  { %19 = dma.hbm_to_vmem [thread:$0]  %s686_s0, 32, %s17_s10, [#allocation3]  }
  0x13   :  { %s518_s25 = scalar_lea.hbm %s687_s1, 1024 }
  0x14   :  { %p519_p8 = scmp.ne.s32.totalorder %s687_s1, %s518_s25  ;;  %p522_p9 = scmp.lt.u32.totalorder %s518_s25, %s687_s1 }
  0x16   :  { %p524_p10 = pnand %p522_p9, %p519_p8 }
  0x18   :  { %527 = shalt.err (!%p524_p10)
}
  0x19   :  { %s528_s30 = scalar_lea.vmem %s595_s12, 1024  ;;  %p533_p12 = scmp.lt.s32.totalorder %s595_s12, %s595_s12 }
  0x1a   :  { %p529_p11 = scmp.ne.s32.totalorder %s595_s12, %s528_s30  ;;  %p534_p13 = scmp.lt.s32.totalorder %s528_s30, %s528_s30 }
  0x1c   :  { %p535_p0 = por %p534_p13, %p533_p12 }
  0x1e   :  { %p536_p1 = pnand %p535_p0, %p529_p11 }
  0x20   :  { %539 = shalt.err (!%p536_p1)
}
  0x21   :  { %s570_s0 = smov 128   ;;  %s571_s3 = smov 8  }
  0x22   :  { %31 = dma.hbm_to_vmem [thread:$0]  %s687_s1, 1024, %s595_s12, [#allocation6], %s570_s0, %s570_s0, %s571_s3  }
  0x23   :  { %562 = dma.done.wait [#allocation3], 32  }
  0x24   :  { %563 = vsyncadd [#allocation3], 4294967264 }
  0x25   :  { %564 = dma.done.wait [#allocation6], 1024  }
  0x26   :  { %565 = vsyncadd [#allocation6], 4294966272  ;;  %v572_v0 = vmov 1   ;;  %v573_v1 = vmov 0   ;;  %v627_v2 = vld [vmem:[#allocation5 + $0x28] sm:$0xff]  ;;  %v631_v3 = vld [vmem:[#allocation5 + $0x30] sm:$0xff]  ;;  %v65_v7 = vlaneseq }
  0x27   :  { %452 = vset.pattern.permute.xlu1 %v572_v0  ;;  %451 = vset.pattern.permute.xlu0 %v573_v1  ;;  %v635_v4 = vld [vmem:[#allocation5 + $0x38] sm:$0xf]  ;;  %v574_v5 = vmov 0.0   ;;  %v575_v6 = vmov 2   ;;  %v38_v11 = vld [vmem:[#allocation2] sm:$0x3] }
  0x28   :  { %82 = vperm.xlu1 %452, %v627_v2   ;;  %51 = vperm.xlu0 %451, %v627_v2   ;;  %v645_v8 = vshrl.u32 %v65_v7, 7  ;;  %vm127_vm0 = vcmask 1043456   ;;  %v39_v39 = vld [vmem:[#allocation5] sm:$0xff]  ;;  %vm117_vm1 = vcmask 162816   ;;  %v40_v41 = vld [vmem:[#allocation5 + $0x8] sm:$0xff]  ;;  %v576_v43 = vmov 3  }
  0x29   :  { %198 = vmatprep.mubr.f32.mxu0 %v574_v5  ;;  %314 = vmatprep.mubr.f32.mxu1 %v574_v5  ;;  %v41_v42 = vld [vmem:[#allocation5 + $0x10] sm:$0xf]  ;;  %v577_v44 = vmov 4   ;;  %v48_v45 = vld [vmem:[#allocation5 + $0x3c] sm:$0x1]  ;;  %s579_s1 = smov [#allocation7]  }
  0x2a   :  { %v67_v9 = vsub.s32 0, %v645_v8  ;;  %v71_v10 = vsub.s32 1, %v645_v8  ;;  %s411_s6 = sshll.u32 %s579_s1, 4  ;;  %vm402_vm2 = vcmp.lt.s32.totalorder %v65_v7, 256  ;;  %s412_s6 = int_to_ptr.vmem [resolvable:$true] %s411_s6 }
  0x2b   :  { %s540_s7 = scalar_lea.vmem %s412_s6, 32  ;;  %p545_p3 = scmp.lt.s32.totalorder %s412_s6, %s412_s6 }
  0x2c   :  { %86 = vperm.xlu1 %452, %v631_v3   ;;  %56 = vperm.xlu0 %451, %v631_v3   ;;  %v68_v12 = vrot.slane %v38_v11, %v67_v9  ;;  %v72_v13 = vrot.slane %v38_v11, %v71_v10  ;;  %v43_v9 = vld [vmem:[#allocation5 + $0x1c] sm:$0xff]  ;;  %v44_v10 = vld [vmem:[#allocation5 + $0x24] sm:$0xf]  ;;  %p541_p2 = scmp.ne.s32.totalorder %s412_s6, %s540_s7  ;;  %p546_p4 = scmp.lt.s32.totalorder %s540_s7, %s540_s7 }
  0x2e   :  { %p547_p5 = por %p546_p4, %p545_p3 }
  0x30   :  { %90 = vperm.xlu1 %452, %v635_v4   ;;  %61 = vperm.xlu0 %451, %v635_v4   ;;  %p548_p6 = pnand %p547_p5, %p541_p2 }
  0x34   :  { %453 = vset.pattern.permute.xlu0 %v575_v6  ;;  %454 = vset.pattern.permute.xlu1 %v575_v6 }
  0x35   :  { %106 = vperm.xlu0 %453, %v627_v2   ;;  %110 = vperm.xlu1 %454, %v631_v3  }
  0x39   :  { %114 = vperm.xlu1 %454, %v635_v4   ;;  %455 = vset.pattern.permute.xlu0 %v576_v43 }
  0x3a   :  { %224 = vperm.xlu0 %455, %v627_v2  }
  0x3d   :  { %456 = vset.pattern.permute.xlu1 %v576_v43 }
  0x3e   :  { %228 = vperm.xlu1 %456, %v631_v3   ;;  %457 = vset.pattern.permute.xlu0 %v577_v44 }
  0x3f   :  { %340 = vperm.xlu0 %457, %v627_v2  }
  0x42   :  { %232 = vperm.xlu1 %456, %v635_v4  }
  0x43   :  { %459 = vset.pattern.permute.xlu0 %v573_v1 }
  0x44   :  { %377 = vperm.xlu0 %459, %v48_v45  }
  0x46   :  { %458 = vset.pattern.permute.xlu1 %v577_v44 }
  0x47   :  { %344 = vperm.xlu1 %458, %v631_v3  }
  0x4b   :  { %348 = vperm.xlu1 %458, %v635_v4   ;;  %v42_v4 = vld [vmem:[#allocation5 + $0x14] sm:$0xff] }
  0xa7   :  { %v83_v14 = vpop.permute.xlu1 %82  ;;  %v52_v15 = vpop.permute.xlu0 %51 }
  0xa8   :  { %v75_v16 = vmul.f32 %v68_v12, %v52_v15  ;;  %v76_v17 = vmul.f32 %v72_v13, %v52_v15 }
  0xaa   :  { %v93_v18 = vadd.f32 %v83_v14, %v75_v16  ;;  %v94_v19 = vadd.f32 %v83_v14, %v76_v17 }
  0xab   :  { %v87_v20 = vpop.permute.xlu1 %86  ;;  %v57_v21 = vpop.permute.xlu0 %56 }
  0xac   :  { %v77_v22 = vmul.f32 %v68_v12, %v57_v21  ;;  %v78_v23 = vmul.f32 %v72_v13, %v57_v21  ;;  %460 = vtanh.f32 %v93_v18 }
  0xad   :  { %462 = vtanh.f32 %v94_v19 }
  0xae   :  { %v95_v24 = vadd.f32 %v87_v20, %v77_v22  ;;  %v96_v25 = vadd.f32 %v87_v20, %v78_v23 }
  0xaf   :  { %v62_v26 = vpop.permute.xlu0 %61  ;;  %v91_v29 = vpop.permute.xlu1 %90 }
  0xb0   :  { %464 = vtanh.f32 %v95_v24  ;;  %v79_v27 = vmul.f32 %v68_v12, %v62_v26  ;;  %v80_v28 = vmul.f32 %v72_v13, %v62_v26 }
  0xb1   :  { %466 = vtanh.f32 %v96_v25 }
  0xb2   :  { %v98_v30 = vadd.f32 %v91_v29, %v80_v28  ;;  %v97_v31 = vadd.f32 %v91_v29, %v79_v27 }
  0xb4   :  { %468 = vtanh.f32 %v98_v30  ;;  %v107_v46 = vpop.permute.xlu0 %106  ;;  %v111_v51 = vpop.permute.xlu1 %110 }
  0xb5   :  { %470 = vtanh.f32 %v97_v31 }
  0xb6   :  { %v461_v32 = vpop.eup %460 }
  0xb7   :  { %v463_v33 = vpop.eup %462 }
  0xb8   :  { %v115_v57 = vpop.permute.xlu1 %114 }
  0xb9   :  { %v225_v11 = vpop.permute.xlu0 %224 }
  0xba   :  { %v465_v34 = vpop.eup %464 }
  0xbb   :  { %v467_v35 = vpop.eup %466  ;;  %v433_v36 = vpack.c.bf16 %v465_v34, %v461_v32 }
  0xbc   :  { %v431_v37 = vpack.c.bf16 %v467_v35, %v463_v33 }
  0xbd   :  { %v229_v15 = vpop.permute.xlu1 %228 }
  0xbe   :  { %432 = vmatprep.subr.bf16.mxu0 %v431_v37  ;;  %v469_v38 = vpop.eup %468  ;;  %v341_v26 = vpop.permute.xlu0 %340 }
  0xbf   :  { %434 = vmatpush1.bf16.msra.mxu0 %v433_v36  ;;  %v471_v40 = vpop.eup %470 }
  0xc0   :  { %421 = vmatprep.subr.msk.mxu0 %vm127_vm0, %v469_v38 }
  0xc1   :  { %v233_v21 = vpop.permute.xlu1 %232 }
  0xc3   :  { %422 = vmatpush1.msk.msra.mxu0 %vm127_vm0, %v471_v40 }
  0xc4   :  { %423 = vmatmul.mubr.msk.f32.vlgmr.msra.gmra.mrb[0].mxu0 %vm117_vm1, %v39_v39 }
  0xc5   :  { %204 = vmatprep.mubr.f32.mxu0 %v574_v5 }
  0xc6   :  { %v345_v27 = vpop.permute.xlu1 %344 }
  0xc8   :  { %424 = vmatmul.mubr.msk.f32.gmra.mrb[2].mxu0 %vm117_vm1, %v40_v41 }
  0xc9   :  { %210 = vmatprep.mubr.f32.mxu0 %v574_v5 }
  0xca   :  { %v349_v38 = vpop.permute.xlu1 %348 }
  0xcc   :  { %425 = vmatmul.mubr.msk.f32.gmra.mrb[4].mxu0 %vm117_vm1, %v41_v42 }
 0x197   :  { %v200_v47 = vpop.f32.mrb[0].mxu0 }
 0x198   :  { %v201_v48 = vadd.f32 %v200_v47, %v107_v46  ;;  %v202_v49 = vpop.f32.mrb[1].mxu0 }
 0x199   :  { %v203_v50 = vadd.f32 %v202_v49, %v107_v46 }
 0x19a   :  { %472 = vtanh.f32 %v201_v48 }
 0x19b   :  { %v206_v52 = vpop.f32.mrb[2].mxu0  ;;  %474 = vtanh.f32 %v203_v50 }
 0x19c   :  { %v207_v53 = vadd.f32 %v206_v52, %v111_v51  ;;  %v208_v54 = vpop.f32.mrb[3].mxu0 }
 0x19d   :  { %v209_v55 = vadd.f32 %v208_v54, %v111_v51  ;;  %v578_v51 = vmov 1966171168  }
 0x19e   :  { %476 = vtanh.f32 %v207_v53  ;;  %v386_v52 = vunpack.c.l.s4 %v578_v51 }
 0x19f   :  { %478 = vtanh.f32 %v209_v55  ;;  %v212_v56 = vpop.f32.mrb[4].mxu0 }
 0x1a0   :  { %v214_v58 = vpop.f32.mrb[5].mxu0  ;;  %v213_v60 = vadd.f32 %v212_v56, %v115_v57 }
 0x1a1   :  { %v215_v59 = vadd.f32 %v214_v58, %v115_v57  ;;  %v387_v57 = vunpack.c.0.s8 %v386_v52  ;;  %v378_v58 = vpop.permute.xlu0 %377 }
 0x1a3   :  { %480 = vtanh.f32 %v215_v59 }
 0x1a4   :  { %v473_v61 = vpop.eup %472  ;;  %482 = vtanh.f32 %v213_v60 }
 0x1a5   :  { %v475_v62 = vpop.eup %474 }
 0x1a8   :  { %v477_v63 = vpop.eup %476 }
 0x1a9   :  { %v479_v0 = vpop.eup %478  ;;  %v437_v1 = vpack.c.bf16 %v477_v63, %v473_v61  ;;  %v390_v63 = vsub.s32 %v387_v57, %v645_v8 }
 0x1aa   :  { %v435_v2 = vpack.c.bf16 %v479_v0, %v475_v62 }
 0x1ac   :  { %436 = vmatprep.subr.bf16.mxu1 %v435_v2 }
 0x1ad   :  { %v481_v3 = vpop.eup %480  ;;  %438 = vmatpush1.bf16.msra.mxu1 %v437_v1 }
 0x1ae   :  { %426 = vmatprep.subr.msk.mxu1 %vm127_vm0, %v481_v3  ;;  %v483_v6 = vpop.eup %482 }
 0x1b1   :  { %427 = vmatpush1.msk.msra.mxu1 %vm127_vm0, %v483_v6 }
 0x1b2   :  { %428 = vmatmul.mubr.msk.f32.vlgmr.msra.gmra.mrb[0].mxu1 %vm117_vm1, %v42_v4 }
 0x1b3   :  { %320 = vmatprep.mubr.f32.mxu1 %v574_v5 }
 0x1b6   :  { %429 = vmatmul.mubr.msk.f32.gmra.mrb[2].mxu1 %vm117_vm1, %v43_v9 }
 0x1b7   :  { %326 = vmatprep.mubr.f32.mxu1 %v574_v5 }
 0x1ba   :  { %430 = vmatmul.mubr.msk.f32.gmra.mrb[4].mxu1 %vm117_vm1, %v44_v10 }
 0x285   :  { %v316_v12 = vpop.f32.mrb[0].mxu1 }
 0x286   :  { %v317_v13 = vadd.f32 %v316_v12, %v225_v11  ;;  %v318_v14 = vpop.f32.mrb[1].mxu1 }
 0x287   :  { %v319_v16 = vadd.f32 %v318_v14, %v225_v11 }
 0x288   :  { %484 = vtanh.f32 %v317_v13 }
 0x289   :  { %v322_v17 = vpop.f32.mrb[2].mxu1  ;;  %486 = vtanh.f32 %v319_v16 }
 0x28a   :  { %v323_v18 = vadd.f32 %v322_v17, %v229_v15  ;;  %v324_v19 = vpop.f32.mrb[3].mxu1 }
 0x28b   :  { %v325_v20 = vadd.f32 %v324_v19, %v229_v15 }
 0x28c   :  { %488 = vtanh.f32 %v323_v18 }
 0x28d   :  { %490 = vtanh.f32 %v325_v20  ;;  %v328_v22 = vpop.f32.mrb[4].mxu1 }
 0x28e   :  { %v329_v5 = vadd.f32 %v328_v22, %v233_v21  ;;  %v330_v23 = vpop.f32.mrb[5].mxu1 }
 0x28f   :  { %v331_v24 = vadd.f32 %v330_v23, %v233_v21 }
 0x290   :  { %492 = vtanh.f32 %v329_v5 }
 0x291   :  { %494 = vtanh.f32 %v331_v24 }
 0x292   :  { %v485_v25 = vpop.eup %484 }
 0x293   :  { %v487_v28 = vpop.eup %486  ;;  %v351_v31 = vmul.f32 %v485_v25, %v341_v26 }
 0x294   :  { %v352_v33 = vmul.f32 %v487_v28, %v341_v26 }
 0x296   :  { %v489_v29 = vpop.eup %488 }
 0x297   :  { %v491_v30 = vpop.eup %490  ;;  %v353_v32 = vmul.f32 %v489_v29, %v345_v27 }
 0x298   :  { %v354_v34 = vmul.f32 %v491_v30, %v345_v27 }
 0x299   :  { %v357_v35 = vadd.f32 %v353_v32, %v351_v31 }
 0x29a   :  { %v493_v36 = vpop.eup %492  ;;  %v366_v37 = vadd.f32 %v354_v34, %v352_v33 }
 0x29b   :  { %v495_v39 = vpop.eup %494  ;;  %v355_v40 = vmul.f32 %v493_v36, %v349_v38 }
 0x29c   :  { %v356_v41 = vmul.f32 %v495_v39, %v349_v38 }
 0x29d   :  { %v358_v42 = vsel %vm127_vm0, %v355_v40, 0.0 }
 0x29e   :  { %v359_v43 = vadd.f32 %v358_v42, %v357_v35  ;;  %v367_v44 = vsel %vm127_vm0, %v356_v41, 0.0 }
 0x29f   :  { %v368_v45 = vadd.f32 %v367_v44, %v366_v37 }
 0x2a0   :  { %v360_v46 = vrot.slane %v359_v43, 4 }
 0x2a1   :  { %v369_v47 = vrot.slane %v368_v45, 4 }
 0x2a2   :  { %v361_v48 = vadd.f32 %v360_v46, %v359_v43 }
 0x2a3   :  { %v370_v49 = vadd.f32 %v369_v47, %v368_v45 }
 0x2a4   :  { %v362_v50 = vrot.slane %v361_v48, 2 }
 0x2a5   :  { %v371_v53 = vrot.slane %v370_v49, 2 }
 0x2a6   :  { %v363_v54 = vadd.f32 %v362_v50, %v361_v48 }
 0x2a7   :  { %v372_v55 = vadd.f32 %v371_v53, %v370_v49 }
 0x2a8   :  { %v364_v56 = vrot.slane %v363_v54, 1 }
 0x2a9   :  { %v373_v59 = vrot.slane %v372_v55, 1 }
 0x2aa   :  { %v365_v60 = vadd.f32 %v364_v56, %v363_v54 }
 0x2ab   :  { %v374_v61 = vadd.f32 %v373_v59, %v372_v55 }
 0x2ac   :  { %v380_v62 = vadd.f32 %v378_v58, %v365_v60 }
 0x2ad   :  { %v381_v0 = vadd.f32 %v378_v58, %v374_v61 }
 0x2af   :  { %v384_v1 = vcombine.low %v380_v62, %v381_v0 }
 0x2b1   :  { %v391_v2 = vrot.slane %v384_v1, %v390_v63 }
 0x2b3   :  { %v398_v3 = vrot.slane %v391_v2, %v390_v63 }
 0x2b5   :  { %404 = vst.msk [vmem:[#allocation7] sm:$0x3] %vm402_vm2, %v398_v3 }
 0x2b6   :  { %551 = shalt.err (!%p548_p6)
}
 0x2b7   :  { %s552_s10 = scalar_lea.hbm %s688_s2, 32 }
 0x2b8   :  { %p553_p7 = scmp.ne.s32.totalorder %s688_s2, %s552_s10  ;;  %p556_p8 = scmp.lt.u32.totalorder %s552_s10, %s688_s2 }
 0x2ba   :  { %p558_p9 = pnand %p556_p8, %p553_p7 }
 0x2bc   :  { %561 = shalt.err (!%p558_p9)
}
 0x2bd   :  { %414 = dma.vmem_to_hbm [thread:$0]  %s412_s6, 32, %s688_s2, [#allocation4]  }
 0x2be   :  { %566 = dma.done.wait [#allocation4], 32  }
 0x2bf   :  { %567 = vsyncadd [#allocation4], 4294967264 }
 0x2c0   :  { %418 = vsyncpa [#allocation3], 1 }
 0x2c1   :  { %419 = vsyncpa [#allocation6], 1 }
 0x2c2   :  { %420 = vsyncpa [#allocation4], 1 }

</bundles_post_ra>
